<compile_context>
chip_gen: v7x
topology: tpu7x:2x2x1
jax: 0.10.0
libtpu: 0.0.40
codegen_flags: <defaults>
</compile_context>

<pallas_src>
import jax
import jax.numpy as jnp
from jax.experimental import pallas as pl
from jax.experimental.pallas import tpu as pltpu


LANE = 128


def _round_up(n, m):
    return ((n + m - 1) // m) * m


def conditioned_mlp_kernel(obs_ref, emb_ref, w1o_ref, w1e_ref, b1_ref,
                           w2_ref, b2_ref, w3_ref, b3_ref, out_ref):
    # obs_ref: (tb, D), emb_ref: (tb, E); weights resident full blocks.
    cdt = w1o_ref.dtype  # matmul operand dtype (f32 default, bf16 optional)
    h1 = jnp.dot(obs_ref[...].astype(cdt), w1o_ref[...],
                 preferred_element_type=jnp.float32)
    h1 = h1 + jnp.dot(emb_ref[...].astype(cdt), w1e_ref[...],
                      preferred_element_type=jnp.float32)
    h1 = jnp.maximum(h1 + b1_ref[...], 0.0)
    h2 = jnp.dot(h1.astype(cdt), w2_ref[...],
                 preferred_element_type=jnp.float32) + b2_ref[...]
    h2 = jnp.maximum(h2, 0.0)
    out = jnp.dot(h2.astype(cdt), w3_ref[...],
                  preferred_element_type=jnp.float32) + b3_ref[...]
    out_ref[...] = out.astype(out_ref.dtype)


def prepare_params(params, n_obs_dims, *, dtype=jnp.float32):
    """One-time prep (hoist out of the forward path): split W1 into obs/emb
    slices, pad the hidden axis to a lane multiple, cast matmul operands."""
    w1, b1, w2, b2, w3, b3 = params
    K, H = w1.shape
    D = n_obs_dims
    Hp = _round_up(H, LANE)

    pad_cols = lambda a: jnp.pad(a, ((0, 0), (0, Hp - a.shape[1])))
    w1o = pad_cols(w1[:D]).astype(dtype)                         # (D,  Hp)
    w1e = pad_cols(w1[D:]).astype(dtype)                         # (E,  Hp)
    b1p = pad_cols(b1).astype(jnp.float32)                       # (1,  Hp)
    w2p = jnp.pad(w2, ((0, Hp - H), (0, Hp - H))).astype(dtype)  # (Hp, Hp)
    b2p = pad_cols(b2).astype(jnp.float32)                       # (1,  Hp)
    w3p = jnp.pad(w3, ((0, Hp - H), (0, 0))).astype(dtype)       # (Hp, A) - A unpadded
    b3p = b3.astype(jnp.float32)                                 # (1,  A)
    return (w1o, w1e, b1p, w2p, b2p, w3p, b3p)


def udrl_np_forward(embs, obses, prepared, *, max_rows_per_block=2048):
    """Pallas forward: pred_layer(embs, obses) -> (B, n_act_dims)."""
    B, D = obses.shape
    _, E = embs.shape
    w1o, w1e, b1, w2, b2, w3, b3 = prepared
    Hp = w2.shape[0]
    A = w3.shape[1]

    # Batch tiling: one grid step for small/medium batches; for large batches
    # use an even number of equal tiles so v7x's two TensorCores stay balanced.
    sub = 16 if w1o.dtype == jnp.bfloat16 else 8
    if B <= max_rows_per_block:
        tb = _round_up(B, sub)
    else:
        n_blocks = _round_up(pl.cdiv(B, max_rows_per_block), 2)
        tb = _round_up(pl.cdiv(B, n_blocks), sub)
    grid = (pl.cdiv(B, tb),)  # ragged trailing block handled by Pallas

    row = lambda i: (i, 0)
    full = lambda i: (0, 0)   # resident weight blocks (same block every step)

    return pl.pallas_call(
        conditioned_mlp_kernel,
        out_shape=jax.ShapeDtypeStruct((B, A), jnp.float32),
        grid_spec=pltpu.PrefetchScalarGridSpec(
            num_scalar_prefetch=0,
            grid=grid,
            in_specs=[
                pl.BlockSpec((tb, D), row),    # obses tile (last dim = full D)
                pl.BlockSpec((tb, E), row),    # embs tile  (last dim = full E)
                pl.BlockSpec((D, Hp), full),   # W1[:D]
                pl.BlockSpec((E, Hp), full),   # W1[D:]
                pl.BlockSpec((1, Hp), full),   # b1
                pl.BlockSpec((Hp, Hp), full),  # W2
                pl.BlockSpec((1, Hp), full),   # b2
                pl.BlockSpec((Hp, A), full),   # W3 (output axis unpadded)
                pl.BlockSpec((1, A), full),    # b3
            ],
            out_specs=pl.BlockSpec((tb, A), row),  # small, unpadded writeback
        ),
        compiler_params=pltpu.CompilerParams(
            dimension_semantics=("parallel",)),
    )(obses, embs, w1o, w1e, b1, w2, b2, w3, b3)


def make_params(key, n_obs_dims, n_emb_dims, n_act_dims, n_hid_dims):
    ks = jax.random.split(key, 6)
    sc = 0.1
    K = n_obs_dims + n_emb_dims
    w1 = sc * jax.random.normal(ks[0], (K, n_hid_dims), jnp.float32)
    b1 = sc * jax.random.normal(ks[1], (1, n_hid_dims), jnp.float32)
    w2 = sc * jax.random.normal(ks[2], (n_hid_dims, n_hid_dims), jnp.float32)
    b2 = sc * jax.random.normal(ks[3], (1, n_hid_dims), jnp.float32)
    w3 = sc * jax.random.normal(ks[4], (n_hid_dims, n_act_dims), jnp.float32)
    b3 = sc * jax.random.normal(ks[5], (1, n_act_dims), jnp.float32)
    return (w1, b1, w2, b2, w3, b3)


def reference_forward(embs, obses, params):
    """Pure-f32 reference (matches PyTorch semantics)."""
    w1, b1, w2, b2, w3, b3 = params
    hi = jax.lax.Precision.HIGHEST
    x = jnp.concatenate([obses, embs], axis=1)
    h1 = jnp.maximum(jnp.dot(x, w1, precision=hi) + b1, 0.0)
    h2 = jnp.maximum(jnp.dot(h1, w2, precision=hi) + b2, 0.0)
    return jnp.dot(h2, w3, precision=hi) + b3


if __name__ == "__main__":
    n_obs_dims, n_emb_dims, n_act_dims, n_hid_dims = 16, 32, 4, 64
    batch = 300  # not a multiple of 8/16 -> exercises the ragged trailing block

    key = jax.random.PRNGKey(0)
    k_p, k_e, k_o = jax.random.split(key, 3)

    params = make_params(k_p, n_obs_dims, n_emb_dims, n_act_dims, n_hid_dims)
    prepared = prepare_params(params, n_obs_dims)  # hoisted: done once at init

    embs = jax.random.normal(k_e, (batch, n_emb_dims), jnp.float32)
    obses = jax.random.normal(k_o, (batch, n_obs_dims), jnp.float32)

    out = udrl_np_forward(embs, obses, prepared)
    out = jax.block_until_ready(out)

    ref = reference_forward(embs, obses, params)
    assert out.shape == (batch, n_act_dims)
    assert jnp.allclose(out, ref, atol=2e-3, rtol=2e-3), \
        float(jnp.max(jnp.abs(out - ref)))

    print("KERNEL_OK")
</pallas_src>

<mosaic_0001>
module attributes {stable_mosaic.version = 11 : i64} {
  func.func @conditioned_mlp_kernel(%arg0: i32, %arg1: memref<304x16xf32, #tpu.memory_space<vmem>>, %arg2: memref<304x32xf32, #tpu.memory_space<vmem>>, %arg3: memref<16x128xf32, #tpu.memory_space<vmem>>, %arg4: memref<32x128xf32, #tpu.memory_space<vmem>>, %arg5: memref<1x128xf32, #tpu.memory_space<vmem>>, %arg6: memref<128x128xf32, #tpu.memory_space<vmem>>, %arg7: memref<1x128xf32, #tpu.memory_space<vmem>>, %arg8: memref<128x4xf32, #tpu.memory_space<vmem>>, %arg9: memref<1x4xf32, #tpu.memory_space<vmem>>, %arg10: memref<304x4xf32, #tpu.memory_space<vmem>>) attributes {dimension_semantics = [#tpu.dimension_semantics<parallel>], iteration_bounds = array<i64: 1>, scalar_prefetch = 0 : i64, scratch_operands = 0 : i64, tpu.core_type = #tpu.core_type<tc>, window_params = [{transform_indices = @transform_0, window_bounds = array<i64: 304, 16>}, {transform_indices = @transform_1, window_bounds = array<i64: 304, 32>}, {pipeline_mode = #tpu.pipeline_mode<synchronous>, transform_indices = @transform_2, window_bounds = array<i64: 16, 128>}, {pipeline_mode = #tpu.pipeline_mode<synchronous>, transform_indices = @transform_3, window_bounds = array<i64: 32, 128>}, {pipeline_mode = #tpu.pipeline_mode<synchronous>, transform_indices = @transform_4, window_bounds = array<i64: 1, 128>}, {pipeline_mode = #tpu.pipeline_mode<synchronous>, transform_indices = @transform_5, window_bounds = array<i64: 128, 128>}, {pipeline_mode = #tpu.pipeline_mode<synchronous>, transform_indices = @transform_6, window_bounds = array<i64: 1, 128>}, {pipeline_mode = #tpu.pipeline_mode<synchronous>, transform_indices = @transform_7, window_bounds = array<i64: 128, 4>}, {pipeline_mode = #tpu.pipeline_mode<synchronous>, transform_indices = @transform_8, window_bounds = array<i64: 1, 4>}, {transform_indices = @transform_9, window_bounds = array<i64: 304, 4>}]} {
    %c0 = arith.constant 0 : index
    %c0_0 = arith.constant 0 : index
    %0 = vector.load %arg1[%c0, %c0_0] : memref<304x16xf32, #tpu.memory_space<vmem>>, vector<304x16xf32>
    %c0_1 = arith.constant 0 : index
    %c0_2 = arith.constant 0 : index
    %1 = vector.load %arg3[%c0_1, %c0_2] : memref<16x128xf32, #tpu.memory_space<vmem>>, vector<16x128xf32>
    %cst = arith.constant dense<0.000000e+00> : vector<304x128xf32>
    %2 = tpu.matmul %0, %1, %cst {dimension_numbers = #tpu.dot_dimension_numbers<[1], [0], [0], [1], [0, 0, 1, 1], [], []>} : vector<304x16xf32>, vector<16x128xf32>, vector<304x128xf32> -> vector<304x128xf32>
    %c0_3 = arith.constant 0 : index
    %c0_4 = arith.constant 0 : index
    %3 = vector.load %arg2[%c0_3, %c0_4] : memref<304x32xf32, #tpu.memory_space<vmem>>, vector<304x32xf32>
    %c0_5 = arith.constant 0 : index
    %c0_6 = arith.constant 0 : index
    %4 = vector.load %arg4[%c0_5, %c0_6] : memref<32x128xf32, #tpu.memory_space<vmem>>, vector<32x128xf32>
    %cst_7 = arith.constant dense<0.000000e+00> : vector<304x128xf32>
    %5 = tpu.matmul %3, %4, %cst_7 {dimension_numbers = #tpu.dot_dimension_numbers<[1], [0], [0], [1], [0, 0, 1, 1], [], []>} : vector<304x32xf32>, vector<32x128xf32>, vector<304x128xf32> -> vector<304x128xf32>
    %6 = arith.addf %2, %5 : vector<304x128xf32>
    %c0_8 = arith.constant 0 : index
    %c0_9 = arith.constant 0 : index
    %7 = vector.load %arg5[%c0_8, %c0_9] : memref<1x128xf32, #tpu.memory_space<vmem>>, vector<1x128xf32>
    %8 = vector.broadcast %7 : vector<1x128xf32> to vector<304x128xf32>
    %9 = arith.addf %6, %8 : vector<304x128xf32>
    %cst_10 = arith.constant 0.000000e+00 : f32
    %10 = vector.broadcast %cst_10 : f32 to vector<304x128xf32>
    %11 = arith.maximumf %9, %10 : vector<304x128xf32>
    %c0_11 = arith.constant 0 : index
    %c0_12 = arith.constant 0 : index
    %12 = vector.load %arg6[%c0_11, %c0_12] : memref<128x128xf32, #tpu.memory_space<vmem>>, vector<128x128xf32>
    %cst_13 = arith.constant dense<0.000000e+00> : vector<304x128xf32>
    %13 = tpu.matmul %11, %12, %cst_13 {dimension_numbers = #tpu.dot_dimension_numbers<[1], [0], [0], [1], [0, 0, 1, 1], [], []>} : vector<304x128xf32>, vector<128x128xf32>, vector<304x128xf32> -> vector<304x128xf32>
    %c0_14 = arith.constant 0 : index
    %c0_15 = arith.constant 0 : index
    %14 = vector.load %arg7[%c0_14, %c0_15] : memref<1x128xf32, #tpu.memory_space<vmem>>, vector<1x128xf32>
    %15 = vector.broadcast %14 : vector<1x128xf32> to vector<304x128xf32>
    %16 = arith.addf %13, %15 : vector<304x128xf32>
    %cst_16 = arith.constant 0.000000e+00 : f32
    %17 = vector.broadcast %cst_16 : f32 to vector<304x128xf32>
    %18 = arith.maximumf %16, %17 : vector<304x128xf32>
    %c0_17 = arith.constant 0 : index
    %c0_18 = arith.constant 0 : index
    %19 = vector.load %arg8[%c0_17, %c0_18] : memref<128x4xf32, #tpu.memory_space<vmem>>, vector<128x4xf32>
    %cst_19 = arith.constant dense<0.000000e+00> : vector<304x4xf32>
    %20 = tpu.matmul %18, %19, %cst_19 {dimension_numbers = #tpu.dot_dimension_numbers<[1], [0], [0], [1], [0, 0, 1, 1], [], []>} : vector<304x128xf32>, vector<128x4xf32>, vector<304x4xf32> -> vector<304x4xf32>
    %c0_20 = arith.constant 0 : index
    %c0_21 = arith.constant 0 : index
    %21 = vector.load %arg9[%c0_20, %c0_21] : memref<1x4xf32, #tpu.memory_space<vmem>>, vector<1x4xf32>
    %22 = vector.broadcast %21 : vector<1x4xf32> to vector<304x4xf32>
    %23 = arith.addf %20, %22 : vector<304x4xf32>
    %c0_22 = arith.constant 0 : index
    %c0_23 = arith.constant 0 : index
    %24 = vector.load %arg10[%c0_22, %c0_23] : memref<304x4xf32, #tpu.memory_space<vmem>>, vector<304x4xf32>
    tpu.vector_store %arg10[%c0_22, %c0_23], %23 {strides = array<i32>} : memref<304x4xf32, #tpu.memory_space<vmem>>, vector<304x4xf32>,
    return
  }
  func.func @transform_0(%arg0: i32) -> (i32, i32) {
    %c0_i32 = arith.constant 0 : i32
    %c0_i32_0 = arith.constant 0 : i32
    return %arg0, %c0_i32 : i32, i32
  }
  func.func @transform_1(%arg0: i32) -> (i32, i32) {
    %c0_i32 = arith.constant 0 : i32
    %c0_i32_0 = arith.constant 0 : i32
    return %arg0, %c0_i32 : i32, i32
  }
  func.func @transform_2(%arg0: i32) -> (i32, i32) {
    %c0_i32 = arith.constant 0 : i32
    %c0_i32_0 = arith.constant 0 : i32
    %c0_i32_1 = arith.constant 0 : i32
    return %c0_i32, %c0_i32_0 : i32, i32
  }
  func.func @transform_3(%arg0: i32) -> (i32, i32) {
    %c0_i32 = arith.constant 0 : i32
    %c0_i32_0 = arith.constant 0 : i32
    %c0_i32_1 = arith.constant 0 : i32
    return %c0_i32, %c0_i32_0 : i32, i32
  }
  func.func @transform_4(%arg0: i32) -> (i32, i32) {
    %c0_i32 = arith.constant 0 : i32
    %c0_i32_0 = arith.constant 0 : i32
    %c0_i32_1 = arith.constant 0 : i32
    return %c0_i32, %c0_i32_0 : i32, i32
  }
  func.func @transform_5(%arg0: i32) -> (i32, i32) {
    %c0_i32 = arith.constant 0 : i32
    %c0_i32_0 = arith.constant 0 : i32
    %c0_i32_1 = arith.constant 0 : i32
    return %c0_i32, %c0_i32_0 : i32, i32
  }
  func.func @transform_6(%arg0: i32) -> (i32, i32) {
    %c0_i32 = arith.constant 0 : i32
    %c0_i32_0 = arith.constant 0 : i32
    %c0_i32_1 = arith.constant 0 : i32
    return %c0_i32, %c0_i32_0 : i32, i32
  }
  func.func @transform_7(%arg0: i32) -> (i32, i32) {
    %c0_i32 = arith.constant 0 : i32
    %c0_i32_0 = arith.constant 0 : i32
    %c0_i32_1 = arith.constant 0 : i32
    return %c0_i32, %c0_i32_0 : i32, i32
  }
  func.func @transform_8(%arg0: i32) -> (i32, i32) {
    %c0_i32 = arith.constant 0 : i32
    %c0_i32_0 = arith.constant 0 : i32
    %c0_i32_1 = arith.constant 0 : i32
    return %c0_i32, %c0_i32_0 : i32, i32
  }
  func.func @transform_9(%arg0: i32) -> (i32, i32) {
    %c0_i32 = arith.constant 0 : i32
    %c0_i32_0 = arith.constant 0 : i32
    return %arg0, %c0_i32 : i32, i32
  }
}

</mosaic_0001>

<bundles_post_ra>
// kernel: tpu_custom_call.1
= control target key start
LH: loop header
LB: loop body
LE: loop exit
PB: predicated region body
PF: predicated region fallthrough
CT: control target
= control target key end

     0   :  { %vm114_vm0 = vcmask 261120   ;;  %vm484_vm1 = vcmask 130048   ;;  %vm1531_vm2 = vcmask 31744   ;;  %s3074_s3 = inlined_call_operand.vmem [shape: f32[32,128], index: 3, kind: input, shape index: {}]   ;;  %s3075_s1 = inlined_call_operand.vmem [shape: f32[300,32], index: 1, kind: input, shape index: {}]   ;;  %s3076_s2 = inlined_call_operand.vmem [shape: f32[16,128], index: 2, kind: input, shape index: {}]   ;;  %s3077_s5 = inlined_call_operand.vmem [shape: f32[128,128], index: 5, kind: input, shape index: {}]   ;;  %s3078_s0 = inlined_call_operand.vmem [shape: f32[300,16], index: 0, kind: input, shape index: {}]   ;;  %s3079_s7 = inlined_call_operand.vmem [shape: f32[128,4], index: 7, kind: input, shape index: {}]   ;;  %s3080_s4 = inlined_call_operand.vmem [shape: f32[1,128], index: 4, kind: input, shape index: {}]   ;;  %s3081_s6 = inlined_call_operand.vmem [shape: f32[1,128], index: 6, kind: input, shape index: {}]   ;;  %s3082_s8 = inlined_call_operand.vmem [shape: f32[1,4], index: 8, kind: input, shape index: {}]   ;;  %s3083_s9 = inlined_call_operand.vmem [shape: f32[300,4], index: 9, kind: output, shape index: {}]  }
   0x1   :  { %v110_v0 = vld [vmem:[%s3074_s3] sm:$0xff]  ;;  %v111_v1 = vld [vmem:[%s3074_s3 + $0x8] sm:$0xff]  ;;  %v112_v2 = vld [vmem:[%s3074_s3 + $0x10] sm:$0xff] }
   0x2   :  { %v2147_v3 = vpack.c.bf16 %v111_v1, %v110_v0  ;;  %v113_v4 = vld [vmem:[%s3074_s3 + $0x18] sm:$0xff]  ;;  %v72_v5 = vld [vmem:[%s3075_s1] sm:$0xff]  ;;  %v71_v8 = vld [vmem:[%s3076_s2 + $0x8] sm:$0xff] }
   0x3   :  { %v2151_v6 = vpack.c.bf16 %v113_v4, %v112_v2  ;;  %1851 = vmatprep.mubr.msk.f32.mxu0 %vm114_vm0, %v72_v5  ;;  %v70_v7 = vld [vmem:[%s3076_s2] sm:$0xff]  ;;  %v73_v10 = vld [vmem:[%s3075_s1 + $0x8] sm:$0xff]  ;;  %v74_v11 = vld [vmem:[%s3075_s1 + $0x10] sm:$0xff] }
   0x4   :  { %2148 = vmatprep.subr.bf16.mxu0 %v2147_v3  ;;  %v2155_v9 = vpack.c.bf16 %v71_v8, %v70_v7  ;;  %v75_v12 = vld [vmem:[%s3075_s1 + $0x18] sm:$0xff]  ;;  %v76_v13 = vld [vmem:[%s3075_s1 + $0x20] sm:$0xff]  ;;  %v77_v14 = vld [vmem:[%s3075_s1 + $0x28] sm:$0xff] }
   0x5   :  { %2150 = vmatpush3.bf16.msra.mxu0 %v2147_v3  ;;  %v78_v15 = vld [vmem:[%s3075_s1 + $0x30] sm:$0xff]  ;;  %v79_v16 = vld [vmem:[%s3075_s1 + $0x38] sm:$0xff]  ;;  %v80_v17 = vld [vmem:[%s3075_s1 + $0x40] sm:$0xff] }
   0x6   :  { %2152 = vmatprep.subr.bf16.mxu0 %v2151_v6  ;;  %v81_v18 = vld [vmem:[%s3075_s1 + $0x48] sm:$0xff]  ;;  %v82_v19 = vld [vmem:[%s3075_s1 + $0x50] sm:$0xff]  ;;  %v83_v20 = vld [vmem:[%s3075_s1 + $0x58] sm:$0xff] }
   0x7   :  { %v84_v21 = vld [vmem:[%s3075_s1 + $0x60] sm:$0xff]  ;;  %v85_v22 = vld [vmem:[%s3075_s1 + $0x68] sm:$0xff]  ;;  %v86_v25 = vld [vmem:[%s3075_s1 + $0x70] sm:$0xff] }
   0x8   :  { %v937_v23 = vld [vmem:[%s3077_s5] sm:$0xff]  ;;  %v938_v24 = vld [vmem:[%s3077_s5 + $0x8] sm:$0xff]  ;;  %v939_v27 = vld [vmem:[%s3077_s5 + $0x10] sm:$0xff] }
   0x9   :  { %2154 = vmatpush3.bf16.msra.mxu0 %v2151_v6  ;;  %v2409_v26 = vpack.c.bf16 %v938_v24, %v937_v23  ;;  %v940_v28 = vld [vmem:[%s3077_s5 + $0x18] sm:$0xff]  ;;  %v88_v31 = vld [vmem:[%s3075_s1 + $0x80] sm:$0xff]  ;;  %v942_v33 = vld [vmem:[%s3077_s5 + $0x28] sm:$0xff] }
   0xa   :  { %2156 = vmatprep.subr.bf16.mxu0 %v2155_v9  ;;  %v87_v29 = vld [vmem:[%s3075_s1 + $0x78] sm:$0xff]  ;;  %v2423_v30 = vpack.c.bf16 %v940_v28, %v939_v27  ;;  %v941_v32 = vld [vmem:[%s3077_s5 + $0x20] sm:$0xff]  ;;  %v89_v34 = vld [vmem:[%s3075_s1 + $0x88] sm:$0xff] }
   0xb   :  { %2223 = vmatprep.subr.bf16.mxu1 %v2409_v26  ;;  %v2442_v35 = vpack.c.bf16 %v942_v33, %v941_v32  ;;  %v90_v36 = vld [vmem:[%s3075_s1 + $0x90] sm:$0xff]  ;;  %v944_v38 = vld [vmem:[%s3077_s5 + $0x38] sm:$0xff]  ;;  %v92_v41 = vld [vmem:[%s3075_s1 + $0xa0] sm:$0xff] }
   0xc   :  { %1852 = vmatmul.mubr.msk.f32.vlgmr.msra.gmra.mrb[0].mxu0 %vm114_vm0, %v73_v10  ;;  %2231 = vmatpush3.bf16.msra.mxu1 %v2409_v26  ;;  %v943_v37 = vld [vmem:[%s3077_s5 + $0x30] sm:$0xff]  ;;  %v91_v39 = vld [vmem:[%s3075_s1 + $0x98] sm:$0xff]  ;;  %v945_v42 = vld [vmem:[%s3077_s5 + $0x40] sm:$0xff] }
   0xd   :  { %2158 = vmatpush3.bf16.msra.mxu0 %v2155_v9  ;;  %1854 = vmatprep.mubr.msk.f32.mxu0 %vm114_vm0, %v74_v11  ;;  %v2460_v40 = vpack.c.bf16 %v944_v38, %v943_v37  ;;  %v946_v43 = vld [vmem:[%s3077_s5 + $0x48] sm:$0xff]  ;;  %v94_v46 = vld [vmem:[%s3075_s1 + $0xb0] sm:$0xff]  ;;  %v948_v48 = vld [vmem:[%s3077_s5 + $0x58] sm:$0xff] }
   0xe   :  { %2160 = vmatprep.subr.bf16.mxu0 %v2409_v26  ;;  %2224 = vmatprep.subr.bf16.mxu1 %v2423_v30  ;;  %v93_v44 = vld [vmem:[%s3075_s1 + $0xa8] sm:$0xff]  ;;  %v2478_v45 = vpack.c.bf16 %v946_v43, %v945_v42  ;;  %v947_v47 = vld [vmem:[%s3077_s5 + $0x50] sm:$0xff]  ;;  %v95_v49 = vld [vmem:[%s3075_s1 + $0xb8] sm:$0xff] }
   0xf   :  { %v2496_v50 = vpack.c.bf16 %v948_v48, %v947_v47  ;;  %v96_v51 = vld [vmem:[%s3075_s1 + $0xc0] sm:$0xff]  ;;  %v950_v53 = vld [vmem:[%s3077_s5 + $0x68] sm:$0xff]  ;;  %v98_v56 = vld [vmem:[%s3075_s1 + $0xd0] sm:$0xff] }
  0x10   :  { %1855 = vmatmul.mubr.msk.f32.gmra.mrb[2].mxu0 %vm114_vm0, %v75_v12  ;;  %2232 = vmatpush3.bf16.msra.mxu1 %v2423_v30  ;;  %v949_v52 = vld [vmem:[%s3077_s5 + $0x60] sm:$0xff]  ;;  %v97_v54 = vld [vmem:[%s3075_s1 + $0xc8] sm:$0xff]  ;;  %v951_v57 = vld [vmem:[%s3077_s5 + $0x70] sm:$0xff] }
  0x11   :  { %1857 = vmatprep.mubr.msk.f32.mxu0 %vm114_vm0, %v76_v13  ;;  %2225 = vmatprep.subr.bf16.mxu1 %v2442_v35  ;;  %v2514_v55 = vpack.c.bf16 %v950_v53, %v949_v52  ;;  %v952_v58 = vld [vmem:[%s3077_s5 + $0x78] sm:$0xff]  ;;  %v100_v61 = vld [vmem:[%s3075_s1 + $0xe0] sm:$0xff]  ;;  %v101_v62 = vld [vmem:[%s3075_s1 + $0xe8] sm:$0xff] }
  0x12   :  { %v99_v59 = vld [vmem:[%s3075_s1 + $0xd8] sm:$0xff]  ;;  %v2532_v60 = vpack.c.bf16 %v952_v58, %v951_v57  ;;  %v102_v63 = vld [vmem:[%s3075_s1 + $0xf0] sm:$0xff]  ;;  %v104_v1 = vld [vmem:[%s3075_s1 + $0x100] sm:$0xff] }
  0x13   :  { %v103_v0 = vld [vmem:[%s3075_s1 + $0xf8] sm:$0xff]  ;;  %v105_v2 = vld [vmem:[%s3075_s1 + $0x108] sm:$0xff]  ;;  %v106_v3 = vld [vmem:[%s3075_s1 + $0x110] sm:$0xff] }
  0x14   :  { %1858 = vmatmul.mubr.msk.f32.gmra.mrb[4].mxu0 %vm114_vm0, %v77_v14  ;;  %2233 = vmatpush3.bf16.msra.mxu1 %v2442_v35  ;;  %v107_v4 = vld [vmem:[%s3075_s1 + $0x118] sm:$0xff]  ;;  %v108_v5 = vld [vmem:[%s3075_s1 + $0x120] sm:$0xff]  ;;  %v109_v6 = vld [vmem:[%s3075_s1 + $0x128] sm:$0xff] }
  0x15   :  { %1860 = vmatprep.mubr.msk.f32.mxu0 %vm114_vm0, %v78_v15  ;;  %2226 = vmatprep.subr.bf16.mxu1 %v2460_v40  ;;  %v32_v7 = vld [vmem:[%s3078_s0] sm:$0xff]  ;;  %v33_v8 = vld [vmem:[%s3078_s0 + $0x8] sm:$0xff]  ;;  %v34_v9 = vld [vmem:[%s3078_s0 + $0x10] sm:$0xff] }
  0x16   :  { %v35_v10 = vld [vmem:[%s3078_s0 + $0x18] sm:$0xff]  ;;  %v36_v11 = vld [vmem:[%s3078_s0 + $0x20] sm:$0xff]  ;;  %v37_v12 = vld [vmem:[%s3078_s0 + $0x28] sm:$0xff] }
  0x17   :  { %v38_v13 = vld [vmem:[%s3078_s0 + $0x30] sm:$0xff]  ;;  %v39_v14 = vld [vmem:[%s3078_s0 + $0x38] sm:$0xff]  ;;  %v40_v15 = vld [vmem:[%s3078_s0 + $0x40] sm:$0xff] }
  0x18   :  { %1861 = vmatmul.mubr.msk.f32.gmra.mrb[6].mxu0 %vm114_vm0, %v79_v16  ;;  %2234 = vmatpush3.bf16.msra.mxu1 %v2460_v40  ;;  %v41_v16 = vld [vmem:[%s3078_s0 + $0x48] sm:$0xff]  ;;  %v48_v23 = vld [vmem:[%s3078_s0 + $0x80] sm:$0xff]  ;;  %v58_v33 = vld [vmem:[%s3078_s0 + $0xd0] sm:$0xff] }
  0x19   :  { %1863 = vmatprep.mubr.msk.f32.mxu0 %vm114_vm0, %v80_v17  ;;  %2227 = vmatprep.subr.bf16.mxu1 %v2478_v45  ;;  %v42_v17 = vld [vmem:[%s3078_s0 + $0x50] sm:$0xff]  ;;  %v49_v24 = vld [vmem:[%s3078_s0 + $0x88] sm:$0xff]  ;;  %v52_v27 = vld [vmem:[%s3078_s0 + $0xa0] sm:$0xff] }
  0x1a   :  { %v53_v28 = vld [vmem:[%s3078_s0 + $0xa8] sm:$0xff]  ;;  %v62_v37 = vld [vmem:[%s3078_s0 + $0xf0] sm:$0xff]  ;;  %v63_v38 = vld [vmem:[%s3078_s0 + $0xf8] sm:$0xff] }
  0x1b   :  { %v57_v32 = vld [vmem:[%s3078_s0 + $0xc8] sm:$0xff]  ;;  %v67_v42 = vld [vmem:[%s3078_s0 + $0x118] sm:$0xff]  ;;  %v68_v43 = vld [vmem:[%s3078_s0 + $0x120] sm:$0xff] }
  0x1c   :  { %1864 = vmatmul.mubr.msk.f32.gmra.mrb[8].mxu0 %vm114_vm0, %v81_v18  ;;  %2235 = vmatpush3.bf16.msra.mxu1 %v2478_v45  ;;  %v43_v18 = vld [vmem:[%s3078_s0 + $0x58] sm:$0xff]  ;;  %v2754_v48 = vld [vmem:[%s3080_s4] ss:$0 sm:$0xff] }
  0x1d   :  { %1866 = vmatprep.mubr.msk.f32.mxu0 %vm114_vm0, %v82_v19  ;;  %2228 = vmatprep.subr.bf16.mxu1 %v2496_v50  ;;  %v44_v19 = vld [vmem:[%s3078_s0 + $0x60] sm:$0xff] }
  0x20   :  { %1867 = vmatmul.mubr.msk.f32.gmra.mrb[10].mxu0 %vm114_vm0, %v83_v20  ;;  %2236 = vmatpush3.bf16.msra.mxu1 %v2496_v50  ;;  %v45_v20 = vld [vmem:[%s3078_s0 + $0x68] sm:$0xff] }
  0x21   :  { %1869 = vmatprep.mubr.msk.f32.mxu0 %vm114_vm0, %v84_v21  ;;  %2229 = vmatprep.subr.bf16.mxu1 %v2514_v55  ;;  %v46_v21 = vld [vmem:[%s3078_s0 + $0x70] sm:$0xff] }
  0x24   :  { %1870 = vmatmul.mubr.msk.f32.gmra.mrb[12].mxu0 %vm114_vm0, %v85_v22  ;;  %2237 = vmatpush3.bf16.msra.mxu1 %v2514_v55  ;;  %v47_v22 = vld [vmem:[%s3078_s0 + $0x78] sm:$0xff] }
  0x25   :  { %1872 = vmatprep.mubr.msk.f32.mxu0 %vm114_vm0, %v86_v25  ;;  %2230 = vmatprep.subr.bf16.mxu1 %v2532_v60  ;;  %v50_v25 = vld [vmem:[%s3078_s0 + $0x90] sm:$0xff] }
  0x28   :  { %1873 = vmatmul.mubr.msk.f32.gmra.mrb[14].mxu0 %vm114_vm0, %v87_v29  ;;  %2238 = vmatpush3.bf16.msra.mxu1 %v2532_v60  ;;  %v54_v29 = vld [vmem:[%s3078_s0 + $0xb0] sm:$0xff] }
  0x29   :  { %1875 = vmatprep.mubr.msk.f32.mxu0 %vm114_vm0, %v88_v31  ;;  %v56_v31 = vld [vmem:[%s3078_s0 + $0xc0] sm:$0xff] }
  0x2c   :  { %1876 = vmatmul.mubr.msk.f32.gmra.mrb[16].mxu0 %vm114_vm0, %v89_v34  ;;  %v59_v34 = vld [vmem:[%s3078_s0 + $0xd8] sm:$0xff] }
  0x2d   :  { %1878 = vmatprep.mubr.msk.f32.mxu0 %vm114_vm0, %v90_v36  ;;  %v61_v36 = vld [vmem:[%s3078_s0 + $0xe8] sm:$0xff] }
  0x30   :  { %1879 = vmatmul.mubr.msk.f32.gmra.mrb[18].mxu0 %vm114_vm0, %v91_v39  ;;  %v64_v39 = vld [vmem:[%s3078_s0 + $0x100] sm:$0xff] }
  0x31   :  { %1881 = vmatprep.mubr.msk.f32.mxu0 %vm114_vm0, %v92_v41  ;;  %v66_v41 = vld [vmem:[%s3078_s0 + $0x110] sm:$0xff] }
  0x34   :  { %1882 = vmatmul.mubr.msk.f32.gmra.mrb[20].mxu0 %vm114_vm0, %v93_v44  ;;  %v69_v44 = vld [vmem:[%s3078_s0 + $0x128] sm:$0xff] }
  0x35   :  { %1884 = vmatprep.mubr.msk.f32.mxu0 %vm114_vm0, %v94_v46  ;;  %v1254_v46 = vld [vmem:[%s3079_s7 + $0x8] sm:$0xff] }
  0x38   :  { %1885 = vmatmul.mubr.msk.f32.gmra.mrb[22].mxu0 %vm114_vm0, %v95_v49 }
  0x39   :  { %1887 = vmatprep.mubr.msk.f32.mxu0 %vm114_vm0, %v96_v51 }
  0x3c   :  { %1888 = vmatmul.mubr.msk.f32.gmra.mrb[24].mxu0 %vm114_vm0, %v97_v54 }
  0x3d   :  { %1890 = vmatprep.mubr.msk.f32.mxu0 %vm114_vm0, %v98_v56 }
  0x40   :  { %1891 = vmatmul.mubr.msk.f32.gmra.mrb[26].mxu0 %vm114_vm0, %v99_v59 }
  0x41   :  { %1893 = vmatprep.mubr.msk.f32.mxu0 %vm114_vm0, %v100_v61 }
  0x44   :  { %1894 = vmatmul.mubr.msk.f32.gmra.mrb[28].mxu0 %vm114_vm0, %v101_v62 }
  0x45   :  { %1896 = vmatprep.mubr.msk.f32.mxu0 %vm114_vm0, %v102_v63 }
  0x48   :  { %1897 = vmatmul.mubr.msk.f32.gmra.mrb[30].mxu0 %vm114_vm0, %v103_v0 }
  0x49   :  { %1899 = vmatprep.mubr.msk.f32.mxu0 %vm114_vm0, %v104_v1 }
  0x4c   :  { %1900 = vmatmul.mubr.msk.f32.gmra.mrb[32].mxu0 %vm114_vm0, %v105_v2 }
  0x4d   :  { %1902 = vmatprep.mubr.msk.f32.mxu0 %vm114_vm0, %v106_v3 }
  0x50   :  { %1903 = vmatmul.mubr.msk.f32.gmra.mrb[34].mxu0 %vm114_vm0, %v107_v4 }
  0x51   :  { %1905 = vmatprep.mubr.msk.f32.mxu0 %vm114_vm0, %v108_v5 }
  0x54   :  { %1906 = vmatmul.mubr.msk.f32.gmra.mrb[36].mxu0 %vm114_vm0, %v109_v6 }
  0x55   :  { %1912 = vmatprep.mubr.msk.f32.mxu0 %vm484_vm1, %v32_v7  ;;  %v1255_v7 = vld [vmem:[%s3079_s7 + $0x10] sm:$0xff] }
  0x58   :  { %1913 = vmatmul.mubr.msk.f32.vlgmr.msra.gmra.mrb[0].mxu0 %vm484_vm1, %v33_v8  ;;  %v1256_v8 = vld [vmem:[%s3079_s7 + $0x18] sm:$0xff] }
  0x59   :  { %1915 = vmatprep.mubr.msk.f32.mxu0 %vm484_vm1, %v34_v9  ;;  %2162 = vmatpush3.bf16.msra.mxu0 %v2409_v26  ;;  %v51_v26 = vld [vmem:[%s3078_s0 + $0x98] sm:$0xff] }
  0x5a   :  { %2164 = vmatprep.subr.bf16.mxu0 %v2423_v30 }
  0x5c   :  { %1916 = vmatmul.mubr.msk.f32.gmra.mrb[2].mxu0 %vm484_vm1, %v35_v10 }
  0x5d   :  { %1918 = vmatprep.mubr.msk.f32.mxu0 %vm484_vm1, %v36_v11  ;;  %2166 = vmatpush3.bf16.msra.mxu0 %v2423_v30  ;;  %v55_v30 = vld [vmem:[%s3078_s0 + $0xb8] sm:$0xff] }
  0x5e   :  { %2168 = vmatprep.subr.bf16.mxu0 %v2442_v35 }
  0x60   :  { %1919 = vmatmul.mubr.msk.f32.gmra.mrb[4].mxu0 %vm484_vm1, %v37_v12 }
  0x61   :  { %1921 = vmatprep.mubr.msk.f32.mxu0 %vm484_vm1, %v38_v13  ;;  %2170 = vmatpush3.bf16.msra.mxu0 %v2442_v35  ;;  %v60_v35 = vld [vmem:[%s3078_s0 + $0xe0] sm:$0xff] }
  0x62   :  { %2172 = vmatprep.subr.bf16.mxu0 %v2460_v40 }
  0x64   :  { %1922 = vmatmul.mubr.msk.f32.gmra.mrb[6].mxu0 %vm484_vm1, %v39_v14  ;;  %v2195_v14 = vpack.c.bf16 %v1256_v8, %v1255_v7 }
  0x65   :  { %1924 = vmatprep.mubr.msk.f32.mxu0 %vm484_vm1, %v40_v15  ;;  %2174 = vmatpush3.bf16.msra.mxu0 %v2460_v40  ;;  %v65_v40 = vld [vmem:[%s3078_s0 + $0x108] sm:$0xff] }
  0x66   :  { %2176 = vmatprep.subr.bf16.mxu0 %v2478_v45 }
  0x68   :  { %1925 = vmatmul.mubr.msk.f32.gmra.mrb[8].mxu0 %vm484_vm1, %v41_v16  ;;  %v1257_v16 = vld [vmem:[%s3079_s7 + $0x20] sm:$0xff] }
  0x69   :  { %1927 = vmatprep.mubr.msk.f32.mxu0 %vm484_vm1, %v42_v17  ;;  %2178 = vmatpush3.bf16.msra.mxu0 %v2478_v45  ;;  %v1253_v45 = vld [vmem:[%s3079_s7] sm:$0xff]  ;;  %v1258_v17 = vld [vmem:[%s3079_s7 + $0x28] sm:$0xff] }
  0x6a   :  { %2180 = vmatprep.subr.bf16.mxu0 %v2496_v50  ;;  %v2191_v47 = vpack.c.bf16 %v1254_v46, %v1253_v45 }
  0x6c   :  { %1928 = vmatmul.mubr.msk.f32.gmra.mrb[10].mxu0 %vm484_vm1, %v43_v18  ;;  %2192 = vmatprep.subr.bf16.mxu1 %v2191_v47 }
  0x6d   :  { %1930 = vmatprep.mubr.msk.f32.mxu0 %vm484_vm1, %v44_v19  ;;  %2182 = vmatpush3.bf16.msra.mxu0 %v2496_v50 }
  0x6e   :  { %2184 = vmatprep.subr.bf16.mxu0 %v2514_v55 }
  0x70   :  { %1931 = vmatmul.mubr.msk.f32.gmra.mrb[12].mxu0 %vm484_vm1, %v45_v20 }
  0x71   :  { %1933 = vmatprep.mubr.msk.f32.mxu0 %vm484_vm1, %v46_v21  ;;  %2186 = vmatpush3.bf16.msra.mxu0 %v2514_v55 }
  0x72   :  { %2188 = vmatprep.subr.bf16.mxu0 %v2532_v60 }
  0x74   :  { %1934 = vmatmul.mubr.msk.f32.gmra.mrb[14].mxu0 %vm484_vm1, %v47_v22 }
  0x75   :  { %1936 = vmatprep.mubr.msk.f32.mxu0 %vm484_vm1, %v48_v23  ;;  %2190 = vmatpush3.bf16.msra.mxu0 %v2532_v60  ;;  %v2199_v23 = vpack.c.bf16 %v1258_v17, %v1257_v16 }
  0x78   :  { %1937 = vmatmul.mubr.msk.f32.gmra.mrb[16].mxu0 %vm484_vm1, %v49_v24 }
  0x79   :  { %1939 = vmatprep.mubr.msk.f32.mxu0 %vm484_vm1, %v50_v25  ;;  %v1259_v25 = vld [vmem:[%s3079_s7 + $0x30] sm:$0xff] }
  0x7c   :  { %1940 = vmatmul.mubr.msk.f32.gmra.mrb[18].mxu0 %vm484_vm1, %v51_v26  ;;  %v1260_v26 = vld [vmem:[%s3079_s7 + $0x38] sm:$0xff] }
  0x7d   :  { %1942 = vmatprep.mubr.msk.f32.mxu0 %vm484_vm1, %v52_v27 }
  0x80   :  { %1943 = vmatmul.mubr.msk.f32.gmra.mrb[20].mxu0 %vm484_vm1, %v53_v28 }
  0x81   :  { %1945 = vmatprep.mubr.msk.f32.mxu0 %vm484_vm1, %v54_v29 }
  0x84   :  { %1946 = vmatmul.mubr.msk.f32.gmra.mrb[22].mxu0 %vm484_vm1, %v55_v30 }
  0x85   :  { %1948 = vmatprep.mubr.msk.f32.mxu0 %vm484_vm1, %v56_v31 }
  0x88   :  { %1949 = vmatmul.mubr.msk.f32.gmra.mrb[24].mxu0 %vm484_vm1, %v57_v32  ;;  %v2203_v32 = vpack.c.bf16 %v1260_v26, %v1259_v25 }
  0x89   :  { %1951 = vmatprep.mubr.msk.f32.mxu0 %vm484_vm1, %v58_v33 }
  0x8c   :  { %1952 = vmatmul.mubr.msk.f32.gmra.mrb[26].mxu0 %vm484_vm1, %v59_v34  ;;  %v1261_v34 = vld [vmem:[%s3079_s7 + $0x40] sm:$0xff] }
  0x8d   :  { %1954 = vmatprep.mubr.msk.f32.mxu0 %vm484_vm1, %v60_v35  ;;  %v1262_v35 = vld [vmem:[%s3079_s7 + $0x48] sm:$0xff] }
  0x90   :  { %1955 = vmatmul.mubr.msk.f32.gmra.mrb[28].mxu0 %vm484_vm1, %v61_v36 }
  0x91   :  { %1957 = vmatprep.mubr.msk.f32.mxu0 %vm484_vm1, %v62_v37 }
  0x94   :  { %1958 = vmatmul.mubr.msk.f32.gmra.mrb[30].mxu0 %vm484_vm1, %v63_v38 }
  0x95   :  { %1960 = vmatprep.mubr.msk.f32.mxu0 %vm484_vm1, %v64_v39 }
  0x98   :  { %1961 = vmatmul.mubr.msk.f32.gmra.mrb[32].mxu0 %vm484_vm1, %v65_v40 }
  0x99   :  { %1963 = vmatprep.mubr.msk.f32.mxu0 %vm484_vm1, %v66_v41  ;;  %v2207_v41 = vpack.c.bf16 %v1262_v35, %v1261_v34 }
  0x9c   :  { %1964 = vmatmul.mubr.msk.f32.gmra.mrb[34].mxu0 %vm484_vm1, %v67_v42 }
  0x9d   :  { %1966 = vmatprep.mubr.msk.f32.mxu0 %vm484_vm1, %v68_v43  ;;  %v1263_v43 = vld [vmem:[%s3079_s7 + $0x50] sm:$0xff] }
  0xa0   :  { %1967 = vmatmul.mubr.msk.f32.gmra.mrb[36].mxu0 %vm484_vm1, %v69_v44  ;;  %v1264_v44 = vld [vmem:[%s3079_s7 + $0x58] sm:$0xff] }
 0x12b   :  { %v1914_v49 = vpop.f32.mrb[0].mxu0 }
 0x12c   :  { %v862_v50 = vadd.f32 %v1914_v49, %v2754_v48  ;;  %v665_v51 = vpop.f32.mrb[1].mxu0 }
 0x12d   :  { %v861_v52 = vadd.f32 %v2754_v48, %v665_v51  ;;  %v2211_v51 = vpack.c.bf16 %v1264_v44, %v1263_v43 }
 0x12e   :  { %v900_v55 = vmax.f32 %v862_v50, 0.0 }
 0x12f   :  { %v899_v53 = vmax.f32 %v861_v52, 0.0  ;;  %v1917_v54 = vpop.f32.mrb[2].mxu0 }
 0x130   :  { %v864_v56 = vadd.f32 %v1917_v54, %v2754_v48  ;;  %v675_v57 = vpop.f32.mrb[3].mxu0  ;;  %v1266_v54 = vld [vmem:[%s3079_s7 + $0x68] sm:$0xff] }
 0x131   :  { %v863_v58 = vadd.f32 %v2754_v48, %v675_v57  ;;  %2001 = vmatprep.mubr.f32.mxu0 %v899_v53  ;;  %v1265_v53 = vld [vmem:[%s3079_s7 + $0x60] sm:$0xff] }
 0x132   :  { %2002 = vmatmul.mubr.f32.vlgmr.msra.gmra.mrb[38].mxu0 %v900_v55  ;;  %v902_v61 = vmax.f32 %v864_v56, 0.0 }
 0x133   :  { %v901_v59 = vmax.f32 %v863_v58, 0.0  ;;  %v1920_v60 = vpop.f32.mrb[4].mxu0 }
 0x134   :  { %v866_v62 = vadd.f32 %v1920_v60, %v2754_v48  ;;  %v685_v63 = vpop.f32.mrb[5].mxu0  ;;  %v2215_v60 = vpack.c.bf16 %v1266_v54, %v1265_v53 }
 0x135   :  { %v865_v0 = vadd.f32 %v2754_v48, %v685_v63  ;;  %2004 = vmatprep.mubr.f32.mxu0 %v901_v59  ;;  %v1268_v63 = vld [vmem:[%s3079_s7 + $0x78] sm:$0xff] }
 0x136   :  { %2005 = vmatmul.mubr.f32.gmra.mrb[40].mxu0 %v902_v61  ;;  %v904_v3 = vmax.f32 %v866_v62, 0.0  ;;  %v1267_v62 = vld [vmem:[%s3079_s7 + $0x70] sm:$0xff] }
 0x137   :  { %v903_v1 = vmax.f32 %v865_v0, 0.0  ;;  %v1923_v2 = vpop.f32.mrb[6].mxu0 }
 0x138   :  { %v868_v4 = vadd.f32 %v1923_v2, %v2754_v48  ;;  %v695_v5 = vpop.f32.mrb[7].mxu0 }
 0x139   :  { %2007 = vmatprep.mubr.f32.mxu0 %v903_v1  ;;  %v867_v6 = vadd.f32 %v2754_v48, %v695_v5  ;;  %v2219_v5 = vpack.c.bf16 %v1268_v63, %v1267_v62 }
 0x13a   :  { %2008 = vmatmul.mubr.f32.gmra.mrb[42].mxu0 %v904_v3  ;;  %v906_v11 = vmax.f32 %v868_v4, 0.0 }
 0x13b   :  { %v1926_v9 = vpop.f32.mrb[8].mxu0  ;;  %v905_v10 = vmax.f32 %v867_v6, 0.0 }
 0x13c   :  { %v870_v12 = vadd.f32 %v1926_v9, %v2754_v48  ;;  %v705_v13 = vpop.f32.mrb[9].mxu0 }
 0x13d   :  { %v869_v15 = vadd.f32 %v2754_v48, %v705_v13  ;;  %2010 = vmatprep.mubr.f32.mxu1 %v905_v10 }
 0x13e   :  { %2011 = vmatmul.mubr.f32.vlgmr.msra.gmra.mrb[0].mxu1 %v906_v11  ;;  %v908_v20 = vmax.f32 %v870_v12, 0.0 }
 0x13f   :  { %v907_v18 = vmax.f32 %v869_v15, 0.0  ;;  %v1929_v19 = vpop.f32.mrb[10].mxu0  ;;  %2194 = vmatpush3.bf16.msra.mxu1 %v2191_v47 }
 0x140   :  { %v872_v21 = vadd.f32 %v1929_v19, %v2754_v48  ;;  %v715_v22 = vpop.f32.mrb[11].mxu0  ;;  %2196 = vmatprep.subr.bf16.mxu1 %v2195_v14 }
 0x141   :  { %v871_v24 = vadd.f32 %v2754_v48, %v715_v22  ;;  %2013 = vmatprep.mubr.f32.mxu1 %v907_v18 }
 0x142   :  { %2014 = vmatmul.mubr.f32.gmra.mrb[2].mxu1 %v908_v20  ;;  %v910_v29 = vmax.f32 %v872_v21, 0.0 }
 0x143   :  { %v909_v27 = vmax.f32 %v871_v24, 0.0  ;;  %v1932_v28 = vpop.f32.mrb[12].mxu0  ;;  %2198 = vmatpush3.bf16.msra.mxu1 %v2195_v14 }
 0x144   :  { %v874_v30 = vadd.f32 %v1932_v28, %v2754_v48  ;;  %v725_v31 = vpop.f32.mrb[13].mxu0  ;;  %2200 = vmatprep.subr.bf16.mxu1 %v2199_v23 }
 0x145   :  { %v873_v33 = vadd.f32 %v2754_v48, %v725_v31  ;;  %2016 = vmatprep.mubr.f32.mxu1 %v909_v27 }
 0x146   :  { %2017 = vmatmul.mubr.f32.gmra.mrb[4].mxu1 %v910_v29  ;;  %v912_v38 = vmax.f32 %v874_v30, 0.0 }
 0x147   :  { %v911_v36 = vmax.f32 %v873_v33, 0.0  ;;  %v1935_v37 = vpop.f32.mrb[14].mxu0  ;;  %2202 = vmatpush3.bf16.msra.mxu1 %v2199_v23 }
 0x148   :  { %v876_v39 = vadd.f32 %v1935_v37, %v2754_v48  ;;  %v735_v40 = vpop.f32.mrb[15].mxu0  ;;  %2204 = vmatprep.subr.bf16.mxu1 %v2203_v32 }
 0x149   :  { %v875_v42 = vadd.f32 %v2754_v48, %v735_v40  ;;  %2019 = vmatprep.mubr.f32.mxu1 %v911_v36 }
 0x14a   :  { %2020 = vmatmul.mubr.f32.gmra.mrb[6].mxu1 %v912_v38  ;;  %v914_v47 = vmax.f32 %v876_v39, 0.0 }
 0x14b   :  { %v913_v45 = vmax.f32 %v875_v42, 0.0  ;;  %v1938_v46 = vpop.f32.mrb[16].mxu0  ;;  %2206 = vmatpush3.bf16.msra.mxu1 %v2203_v32 }
 0x14c   :  { %v878_v49 = vadd.f32 %v1938_v46, %v2754_v48  ;;  %v745_v50 = vpop.f32.mrb[17].mxu0  ;;  %2208 = vmatprep.subr.bf16.mxu1 %v2207_v41 }
 0x14d   :  { %v877_v52 = vadd.f32 %v2754_v48, %v745_v50  ;;  %2022 = vmatprep.mubr.f32.mxu1 %v913_v45 }
 0x14e   :  { %2023 = vmatmul.mubr.f32.gmra.mrb[8].mxu1 %v914_v47  ;;  %v916_v57 = vmax.f32 %v878_v49, 0.0 }
 0x14f   :  { %v915_v55 = vmax.f32 %v877_v52, 0.0  ;;  %v1941_v56 = vpop.f32.mrb[18].mxu0  ;;  %2210 = vmatpush3.bf16.msra.mxu1 %v2207_v41 }
 0x150   :  { %v880_v58 = vadd.f32 %v1941_v56, %v2754_v48  ;;  %v755_v59 = vpop.f32.mrb[19].mxu0  ;;  %2212 = vmatprep.subr.bf16.mxu1 %v2211_v51 }
 0x151   :  { %v879_v61 = vadd.f32 %v2754_v48, %v755_v59  ;;  %2025 = vmatprep.mubr.f32.mxu1 %v915_v55 }
 0x152   :  { %2026 = vmatmul.mubr.f32.gmra.mrb[10].mxu1 %v916_v57  ;;  %v918_v2 = vmax.f32 %v880_v58, 0.0  ;;  %v2839_v58 = vld [vmem:[%s3081_s6] ss:$0 sm:$0xff] }
 0x153   :  { %v917_v0 = vmax.f32 %v879_v61, 0.0  ;;  %v1944_v1 = vpop.f32.mrb[20].mxu0  ;;  %2214 = vmatpush3.bf16.msra.mxu1 %v2211_v51 }
 0x154   :  { %v882_v3 = vadd.f32 %v1944_v1, %v2754_v48  ;;  %v765_v4 = vpop.f32.mrb[21].mxu0  ;;  %2216 = vmatprep.subr.bf16.mxu1 %v2215_v60 }
 0x155   :  { %v881_v6 = vadd.f32 %v2754_v48, %v765_v4  ;;  %2028 = vmatprep.mubr.f32.mxu1 %v917_v0 }
 0x156   :  { %2029 = vmatmul.mubr.f32.gmra.mrb[12].mxu1 %v918_v2  ;;  %v920_v9 = vmax.f32 %v882_v3, 0.0 }
 0x157   :  { %v919_v7 = vmax.f32 %v881_v6, 0.0  ;;  %v1947_v8 = vpop.f32.mrb[22].mxu0  ;;  %2218 = vmatpush3.bf16.msra.mxu1 %v2215_v60 }
 0x158   :  { %v884_v10 = vadd.f32 %v1947_v8, %v2754_v48  ;;  %v775_v11 = vpop.f32.mrb[23].mxu0  ;;  %2220 = vmatprep.subr.bf16.mxu1 %v2219_v5 }
 0x159   :  { %v883_v12 = vadd.f32 %v2754_v48, %v775_v11  ;;  %2031 = vmatprep.mubr.f32.mxu1 %v919_v7 }
 0x15a   :  { %2032 = vmatmul.mubr.f32.gmra.mrb[14].mxu1 %v920_v9  ;;  %v922_v15 = vmax.f32 %v884_v10, 0.0 }
 0x15b   :  { %v921_v13 = vmax.f32 %v883_v12, 0.0  ;;  %v1950_v14 = vpop.f32.mrb[24].mxu0  ;;  %2222 = vmatpush3.bf16.msra.mxu1 %v2219_v5 }
 0x15c   :  { %v886_v16 = vadd.f32 %v1950_v14, %v2754_v48  ;;  %v785_v17 = vpop.f32.mrb[25].mxu0 }
 0x15d   :  { %v885_v18 = vadd.f32 %v2754_v48, %v785_v17  ;;  %2034 = vmatprep.mubr.f32.mxu1 %v921_v13 }
 0x15e   :  { %2035 = vmatmul.mubr.f32.gmra.mrb[16].mxu1 %v922_v15  ;;  %v924_v21 = vmax.f32 %v886_v16, 0.0 }
 0x15f   :  { %v923_v19 = vmax.f32 %v885_v18, 0.0  ;;  %v1953_v20 = vpop.f32.mrb[26].mxu0 }
 0x160   :  { %v888_v22 = vadd.f32 %v1953_v20, %v2754_v48  ;;  %v795_v23 = vpop.f32.mrb[27].mxu0 }
 0x161   :  { %v887_v24 = vadd.f32 %v2754_v48, %v795_v23  ;;  %2037 = vmatprep.mubr.f32.mxu1 %v923_v19 }
 0x162   :  { %2038 = vmatmul.mubr.f32.gmra.mrb[18].mxu1 %v924_v21  ;;  %v926_v27 = vmax.f32 %v888_v22, 0.0 }
 0x163   :  { %v925_v25 = vmax.f32 %v887_v24, 0.0  ;;  %v1956_v26 = vpop.f32.mrb[28].mxu0 }
 0x164   :  { %v890_v28 = vadd.f32 %v1956_v26, %v2754_v48  ;;  %v805_v29 = vpop.f32.mrb[29].mxu0 }
 0x165   :  { %v889_v30 = vadd.f32 %v2754_v48, %v805_v29  ;;  %2040 = vmatprep.mubr.f32.mxu1 %v925_v25 }
 0x166   :  { %2041 = vmatmul.mubr.f32.gmra.mrb[20].mxu1 %v926_v27  ;;  %v928_v33 = vmax.f32 %v890_v28, 0.0 }
 0x167   :  { %v927_v31 = vmax.f32 %v889_v30, 0.0  ;;  %v1959_v32 = vpop.f32.mrb[30].mxu0 }
 0x168   :  { %v892_v34 = vadd.f32 %v1959_v32, %v2754_v48  ;;  %v815_v35 = vpop.f32.mrb[31].mxu0 }
 0x169   :  { %v891_v36 = vadd.f32 %v2754_v48, %v815_v35  ;;  %2043 = vmatprep.mubr.f32.mxu1 %v927_v31 }
 0x16a   :  { %2044 = vmatmul.mubr.f32.gmra.mrb[22].mxu1 %v928_v33  ;;  %v930_v39 = vmax.f32 %v892_v34, 0.0 }
 0x16b   :  { %v929_v37 = vmax.f32 %v891_v36, 0.0  ;;  %v1962_v38 = vpop.f32.mrb[32].mxu0 }
 0x16c   :  { %v894_v40 = vadd.f32 %v1962_v38, %v2754_v48  ;;  %v825_v41 = vpop.f32.mrb[33].mxu0 }
 0x16d   :  { %v893_v42 = vadd.f32 %v2754_v48, %v825_v41  ;;  %2046 = vmatprep.mubr.f32.mxu1 %v929_v37 }
 0x16e   :  { %2047 = vmatmul.mubr.f32.gmra.mrb[24].mxu1 %v930_v39  ;;  %v932_v45 = vmax.f32 %v894_v40, 0.0 }
 0x16f   :  { %v931_v43 = vmax.f32 %v893_v42, 0.0  ;;  %v1965_v44 = vpop.f32.mrb[34].mxu0 }
 0x170   :  { %v896_v46 = vadd.f32 %v1965_v44, %v2754_v48  ;;  %v835_v47 = vpop.f32.mrb[35].mxu0 }
 0x171   :  { %v895_v49 = vadd.f32 %v2754_v48, %v835_v47  ;;  %2049 = vmatprep.mubr.f32.mxu1 %v931_v43 }
 0x172   :  { %2050 = vmatmul.mubr.f32.gmra.mrb[26].mxu1 %v932_v45  ;;  %v934_v52 = vmax.f32 %v896_v46, 0.0 }
 0x173   :  { %v933_v50 = vmax.f32 %v895_v49, 0.0  ;;  %v1968_v51 = vpop.f32.mrb[36].mxu0 }
 0x174   :  { %v898_v53 = vadd.f32 %v1968_v51, %v2754_v48  ;;  %v845_v54 = vpop.f32.mrb[37].mxu0 }
 0x175   :  { %v897_v55 = vadd.f32 %v2754_v48, %v845_v54  ;;  %2052 = vmatprep.mubr.f32.mxu1 %v933_v50 }
 0x176   :  { %2053 = vmatmul.mubr.f32.gmra.mrb[28].mxu1 %v934_v52  ;;  %v936_v57 = vmax.f32 %v898_v53, 0.0 }
 0x177   :  { %v935_v56 = vmax.f32 %v897_v55, 0.0 }
 0x179   :  { %2055 = vmatprep.mubr.f32.mxu1 %v935_v56 }
 0x17a   :  { %2056 = vmatmul.mubr.f32.gmra.mrb[30].mxu1 %v936_v57 }
 0x205   :  { %v2003_v59 = vpop.f32.mrb[38].mxu0 }
 0x206   :  { %v1032_v60 = vadd.f32 %v2003_v59, %v2839_v58  ;;  %v1026_v61 = vpop.f32.mrb[39].mxu0 }
 0x207   :  { %v1027_v62 = vadd.f32 %v2839_v58, %v1026_v61 }
 0x208   :  { %v1216_v48 = vmax.f32 %v1032_v60, 0.0 }
 0x209   :  { %v1215_v63 = vmax.f32 %v1027_v62, 0.0  ;;  %v2006_v0 = vpop.f32.mrb[40].mxu0 }
 0x20a   :  { %v1042_v1 = vadd.f32 %v2006_v0, %v2839_v58  ;;  %v1036_v2 = vpop.f32.mrb[41].mxu0 }
 0x20b   :  { %v1037_v3 = vadd.f32 %v2839_v58, %v1036_v2  ;;  %2090 = vmatprep.mubr.f32.mxu1 %v1215_v63 }
 0x20c   :  { %2091 = vmatmul.mubr.f32.vlgmr.msra.gmra.mrb[32].mxu1 %v1216_v48  ;;  %v1218_v6 = vmax.f32 %v1042_v1, 0.0 }
 0x20d   :  { %v1217_v4 = vmax.f32 %v1037_v3, 0.0  ;;  %v2009_v5 = vpop.f32.mrb[42].mxu0 }
 0x20e   :  { %v1052_v7 = vadd.f32 %v2009_v5, %v2839_v58  ;;  %v1046_v8 = vpop.f32.mrb[43].mxu0 }
 0x20f   :  { %v1047_v9 = vadd.f32 %v2839_v58, %v1046_v8  ;;  %2093 = vmatprep.mubr.f32.mxu1 %v1217_v4 }
 0x210   :  { %2094 = vmatmul.mubr.f32.gmra.mrb[34].mxu1 %v1218_v6  ;;  %v1220_v12 = vmax.f32 %v1052_v7, 0.0 }
 0x211   :  { %v1219_v10 = vmax.f32 %v1047_v9, 0.0  ;;  %v2012_v11 = vpop.f32.mrb[0].mxu1 }
 0x212   :  { %v1062_v13 = vadd.f32 %v2012_v11, %v2839_v58  ;;  %v1056_v14 = vpop.f32.mrb[1].mxu1 }
 0x213   :  { %v1057_v15 = vadd.f32 %v2839_v58, %v1056_v14  ;;  %2096 = vmatprep.mubr.f32.mxu1 %v1219_v10 }
 0x214   :  { %2097 = vmatmul.mubr.f32.gmra.mrb[36].mxu1 %v1220_v12  ;;  %v1222_v18 = vmax.f32 %v1062_v13, 0.0 }
 0x215   :  { %v1221_v16 = vmax.f32 %v1057_v15, 0.0  ;;  %v2015_v17 = vpop.f32.mrb[2].mxu1 }
 0x216   :  { %v1072_v19 = vadd.f32 %v2015_v17, %v2839_v58  ;;  %v1066_v20 = vpop.f32.mrb[3].mxu1 }
 0x217   :  { %v1067_v21 = vadd.f32 %v2839_v58, %v1066_v20  ;;  %2099 = vmatprep.mubr.f32.mxu1 %v1221_v16 }
 0x218   :  { %2100 = vmatmul.mubr.f32.gmra.mrb[38].mxu1 %v1222_v18  ;;  %v1224_v24 = vmax.f32 %v1072_v19, 0.0 }
 0x219   :  { %v1223_v22 = vmax.f32 %v1067_v21, 0.0  ;;  %v2018_v23 = vpop.f32.mrb[4].mxu1 }
 0x21a   :  { %v1082_v25 = vadd.f32 %v2018_v23, %v2839_v58  ;;  %v1076_v26 = vpop.f32.mrb[5].mxu1 }
 0x21b   :  { %v1077_v27 = vadd.f32 %v2839_v58, %v1076_v26  ;;  %2102 = vmatprep.mubr.f32.mxu1 %v1223_v22 }
 0x21c   :  { %2103 = vmatmul.mubr.f32.gmra.mrb[40].mxu1 %v1224_v24  ;;  %v1226_v30 = vmax.f32 %v1082_v25, 0.0 }
 0x21d   :  { %v1225_v28 = vmax.f32 %v1077_v27, 0.0  ;;  %v2021_v29 = vpop.f32.mrb[6].mxu1 }
 0x21e   :  { %v1092_v31 = vadd.f32 %v2021_v29, %v2839_v58  ;;  %v1086_v32 = vpop.f32.mrb[7].mxu1 }
 0x21f   :  { %v1087_v33 = vadd.f32 %v2839_v58, %v1086_v32  ;;  %2105 = vmatprep.mubr.f32.mxu1 %v1225_v28 }
 0x220   :  { %2106 = vmatmul.mubr.f32.gmra.mrb[42].mxu1 %v1226_v30  ;;  %v1228_v36 = vmax.f32 %v1092_v31, 0.0 }
 0x221   :  { %v1227_v34 = vmax.f32 %v1087_v33, 0.0  ;;  %v2024_v35 = vpop.f32.mrb[8].mxu1 }
 0x222   :  { %v1102_v37 = vadd.f32 %v2024_v35, %v2839_v58  ;;  %v1096_v38 = vpop.f32.mrb[9].mxu1 }
 0x223   :  { %v1097_v39 = vadd.f32 %v2839_v58, %v1096_v38  ;;  %2108 = vmatprep.mubr.f32.mxu1 %v1227_v34 }
 0x224   :  { %2109 = vmatmul.mubr.f32.gmra.mrb[44].mxu1 %v1228_v36  ;;  %v1230_v42 = vmax.f32 %v1102_v37, 0.0 }
 0x225   :  { %v1229_v40 = vmax.f32 %v1097_v39, 0.0  ;;  %v2027_v41 = vpop.f32.mrb[10].mxu1 }
 0x226   :  { %v1112_v43 = vadd.f32 %v2027_v41, %v2839_v58  ;;  %v1106_v44 = vpop.f32.mrb[11].mxu1 }
 0x227   :  { %v1107_v45 = vadd.f32 %v2839_v58, %v1106_v44  ;;  %2111 = vmatprep.mubr.f32.mxu1 %v1229_v40 }
 0x228   :  { %2112 = vmatmul.mubr.f32.gmra.mrb[46].mxu1 %v1230_v42  ;;  %v1232_v49 = vmax.f32 %v1112_v43, 0.0 }
 0x229   :  { %v1231_v46 = vmax.f32 %v1107_v45, 0.0  ;;  %v2030_v47 = vpop.f32.mrb[12].mxu1  ;;  %v2882_v45 = vld [vmem:[%s3082_s8] ss:$0 sm:$0xff] }
 0x22a   :  { %v1122_v50 = vadd.f32 %v2030_v47, %v2839_v58  ;;  %v1116_v51 = vpop.f32.mrb[13].mxu1 }
 0x22b   :  { %v1117_v52 = vadd.f32 %v2839_v58, %v1116_v51  ;;  %2114 = vmatprep.mubr.f32.mxu1 %v1231_v46 }
 0x22c   :  { %2115 = vmatmul.mubr.f32.gmra.mrb[48].mxu1 %v1232_v49  ;;  %v1234_v55 = vmax.f32 %v1122_v50, 0.0 }
 0x22d   :  { %v1233_v53 = vmax.f32 %v1117_v52, 0.0  ;;  %v2033_v54 = vpop.f32.mrb[14].mxu1 }
 0x22e   :  { %v1132_v56 = vadd.f32 %v2033_v54, %v2839_v58  ;;  %v1126_v57 = vpop.f32.mrb[15].mxu1 }
 0x22f   :  { %v1127_v59 = vadd.f32 %v2839_v58, %v1126_v57  ;;  %2117 = vmatprep.mubr.f32.mxu1 %v1233_v53 }
 0x230   :  { %2118 = vmatmul.mubr.f32.gmra.mrb[50].mxu1 %v1234_v55  ;;  %v1236_v62 = vmax.f32 %v1132_v56, 0.0 }
 0x231   :  { %v1235_v60 = vmax.f32 %v1127_v59, 0.0  ;;  %v2036_v61 = vpop.f32.mrb[16].mxu1 }
 0x232   :  { %v1142_v63 = vadd.f32 %v2036_v61, %v2839_v58  ;;  %v1136_v0 = vpop.f32.mrb[17].mxu1 }
 0x233   :  { %v1137_v48 = vadd.f32 %v2839_v58, %v1136_v0  ;;  %2120 = vmatprep.mubr.f32.mxu1 %v1235_v60 }
 0x234   :  { %2121 = vmatmul.mubr.f32.gmra.mrb[52].mxu1 %v1236_v62  ;;  %v1238_v3 = vmax.f32 %v1142_v63, 0.0 }
 0x235   :  { %v1237_v1 = vmax.f32 %v1137_v48, 0.0  ;;  %v2039_v2 = vpop.f32.mrb[18].mxu1 }
 0x236   :  { %v1152_v4 = vadd.f32 %v2039_v2, %v2839_v58  ;;  %v1146_v5 = vpop.f32.mrb[19].mxu1 }
 0x237   :  { %v1147_v6 = vadd.f32 %v2839_v58, %v1146_v5  ;;  %2123 = vmatprep.mubr.f32.mxu1 %v1237_v1 }
 0x238   :  { %2124 = vmatmul.mubr.f32.gmra.mrb[54].mxu1 %v1238_v3  ;;  %v1240_v9 = vmax.f32 %v1152_v4, 0.0 }
 0x239   :  { %v1239_v7 = vmax.f32 %v1147_v6, 0.0  ;;  %v2042_v8 = vpop.f32.mrb[20].mxu1 }
 0x23a   :  { %v1162_v10 = vadd.f32 %v2042_v8, %v2839_v58  ;;  %v1156_v11 = vpop.f32.mrb[21].mxu1 }
 0x23b   :  { %v1157_v12 = vadd.f32 %v2839_v58, %v1156_v11  ;;  %2126 = vmatprep.mubr.f32.mxu1 %v1239_v7 }
 0x23c   :  { %2127 = vmatmul.mubr.f32.gmra.mrb[56].mxu1 %v1240_v9  ;;  %v1242_v15 = vmax.f32 %v1162_v10, 0.0 }
 0x23d   :  { %v1241_v13 = vmax.f32 %v1157_v12, 0.0  ;;  %v2045_v14 = vpop.f32.mrb[22].mxu1 }
 0x23e   :  { %v1172_v16 = vadd.f32 %v2045_v14, %v2839_v58  ;;  %v1166_v17 = vpop.f32.mrb[23].mxu1 }
 0x23f   :  { %v1167_v18 = vadd.f32 %v2839_v58, %v1166_v17  ;;  %2129 = vmatprep.mubr.f32.mxu1 %v1241_v13 }
 0x240   :  { %2130 = vmatmul.mubr.f32.gmra.mrb[58].mxu1 %v1242_v15  ;;  %v1244_v21 = vmax.f32 %v1172_v16, 0.0 }
 0x241   :  { %v1243_v19 = vmax.f32 %v1167_v18, 0.0  ;;  %v2048_v20 = vpop.f32.mrb[24].mxu1 }
 0x242   :  { %v1182_v22 = vadd.f32 %v2048_v20, %v2839_v58  ;;  %v1176_v23 = vpop.f32.mrb[25].mxu1 }
 0x243   :  { %v1177_v24 = vadd.f32 %v2839_v58, %v1176_v23  ;;  %2132 = vmatprep.mubr.f32.mxu1 %v1243_v19 }
 0x244   :  { %2133 = vmatmul.mubr.f32.gmra.mrb[60].mxu1 %v1244_v21  ;;  %v1246_v27 = vmax.f32 %v1182_v22, 0.0 }
 0x245   :  { %v1245_v25 = vmax.f32 %v1177_v24, 0.0  ;;  %v2051_v26 = vpop.f32.mrb[26].mxu1 }
 0x246   :  { %v1192_v28 = vadd.f32 %v2051_v26, %v2839_v58  ;;  %v1186_v29 = vpop.f32.mrb[27].mxu1 }
 0x247   :  { %v1187_v30 = vadd.f32 %v2839_v58, %v1186_v29  ;;  %2135 = vmatprep.mubr.f32.mxu1 %v1245_v25 }
 0x248   :  { %2136 = vmatmul.mubr.f32.gmra.mrb[62].mxu1 %v1246_v27  ;;  %v1248_v33 = vmax.f32 %v1192_v28, 0.0 }
 0x249   :  { %v1247_v31 = vmax.f32 %v1187_v30, 0.0  ;;  %v2054_v32 = vpop.f32.mrb[28].mxu1 }
 0x24a   :  { %v1202_v34 = vadd.f32 %v2054_v32, %v2839_v58  ;;  %v1196_v35 = vpop.f32.mrb[29].mxu1 }
 0x24b   :  { %v1197_v36 = vadd.f32 %v2839_v58, %v1196_v35  ;;  %2138 = vmatprep.mubr.f32.mxu1 %v1247_v31 }
 0x24c   :  { %2139 = vmatmul.mubr.f32.gmra.mrb[64].mxu1 %v1248_v33  ;;  %v1250_v39 = vmax.f32 %v1202_v34, 0.0 }
 0x24d   :  { %v1249_v37 = vmax.f32 %v1197_v36, 0.0  ;;  %v2057_v38 = vpop.f32.mrb[30].mxu1 }
 0x24e   :  { %v1212_v40 = vadd.f32 %v2057_v38, %v2839_v58  ;;  %v1206_v41 = vpop.f32.mrb[31].mxu1 }
 0x24f   :  { %v1207_v42 = vadd.f32 %v2839_v58, %v1206_v41  ;;  %2141 = vmatprep.mubr.f32.mxu1 %v1249_v37 }
 0x250   :  { %2142 = vmatmul.mubr.f32.gmra.mrb[66].mxu1 %v1250_v39  ;;  %v1252_v44 = vmax.f32 %v1212_v40, 0.0 }
 0x251   :  { %v1251_v43 = vmax.f32 %v1207_v42, 0.0 }
 0x253   :  { %2144 = vmatprep.mubr.f32.mxu1 %v1251_v43 }
 0x254   :  { %2145 = vmatmul.mubr.f32.gmra.mrb[68].mxu1 %v1252_v44 }
 0x2df   :  { %v2092_v46 = vpop.f32.mrb[32].mxu1 }
 0x2e0   :  { %v1348_v47 = vadd.f32 %v2092_v46, %v2882_v45  ;;  %v1342_v49 = vpop.f32.mrb[33].mxu1 }
 0x2e1   :  { %v1343_v50 = vadd.f32 %v2882_v45, %v1342_v49 }
 0x2e2   :  { %1533 = vst.msk [vmem:[%s3083_s9 + $0x8] sm:$0xff] %vm1531_vm2, %v1348_v47 }
 0x2e3   :  { %1532 = vst.msk [vmem:[%s3083_s9] sm:$0xff] %vm1531_vm2, %v1343_v50  ;;  %v2095_v58 = vpop.f32.mrb[34].mxu1 }
 0x2e4   :  { %v1358_v51 = vadd.f32 %v2095_v58, %v2882_v45  ;;  %v1352_v52 = vpop.f32.mrb[35].mxu1 }
 0x2e5   :  { %v1353_v53 = vadd.f32 %v2882_v45, %v1352_v52 }
 0x2e6   :  { %1535 = vst.msk [vmem:[%s3083_s9 + $0x18] sm:$0xff] %vm1531_vm2, %v1358_v51 }
 0x2e7   :  { %1534 = vst.msk [vmem:[%s3083_s9 + $0x10] sm:$0xff] %vm1531_vm2, %v1353_v53  ;;  %v2098_v54 = vpop.f32.mrb[36].mxu1 }
 0x2e8   :  { %v1368_v55 = vadd.f32 %v2098_v54, %v2882_v45  ;;  %v1362_v56 = vpop.f32.mrb[37].mxu1 }
 0x2e9   :  { %v1363_v57 = vadd.f32 %v2882_v45, %v1362_v56 }
 0x2ea   :  { %1537 = vst.msk [vmem:[%s3083_s9 + $0x28] sm:$0xff] %vm1531_vm2, %v1368_v55 }
 0x2eb   :  { %1536 = vst.msk [vmem:[%s3083_s9 + $0x20] sm:$0xff] %vm1531_vm2, %v1363_v57  ;;  %v2101_v59 = vpop.f32.mrb[38].mxu1 }
 0x2ec   :  { %v1378_v60 = vadd.f32 %v2101_v59, %v2882_v45  ;;  %v1372_v61 = vpop.f32.mrb[39].mxu1 }
 0x2ed   :  { %v1373_v62 = vadd.f32 %v2882_v45, %v1372_v61 }
 0x2ee   :  { %1539 = vst.msk [vmem:[%s3083_s9 + $0x38] sm:$0xff] %vm1531_vm2, %v1378_v60 }
 0x2ef   :  { %1538 = vst.msk [vmem:[%s3083_s9 + $0x30] sm:$0xff] %vm1531_vm2, %v1373_v62  ;;  %v2104_v63 = vpop.f32.mrb[40].mxu1 }
 0x2f0   :  { %v1388_v0 = vadd.f32 %v2104_v63, %v2882_v45  ;;  %v1382_v48 = vpop.f32.mrb[41].mxu1 }
 0x2f1   :  { %v1383_v1 = vadd.f32 %v2882_v45, %v1382_v48 }
 0x2f2   :  { %1541 = vst.msk [vmem:[%s3083_s9 + $0x48] sm:$0xff] %vm1531_vm2, %v1388_v0 }
 0x2f3   :  { %1540 = vst.msk [vmem:[%s3083_s9 + $0x40] sm:$0xff] %vm1531_vm2, %v1383_v1  ;;  %v2107_v2 = vpop.f32.mrb[42].mxu1 }
 0x2f4   :  { %v1398_v3 = vadd.f32 %v2107_v2, %v2882_v45  ;;  %v1392_v4 = vpop.f32.mrb[43].mxu1 }
 0x2f5   :  { %v1393_v5 = vadd.f32 %v2882_v45, %v1392_v4 }
 0x2f6   :  { %1543 = vst.msk [vmem:[%s3083_s9 + $0x58] sm:$0xff] %vm1531_vm2, %v1398_v3 }
 0x2f7   :  { %1542 = vst.msk [vmem:[%s3083_s9 + $0x50] sm:$0xff] %vm1531_vm2, %v1393_v5  ;;  %v2110_v6 = vpop.f32.mrb[44].mxu1 }
 0x2f8   :  { %v1408_v7 = vadd.f32 %v2110_v6, %v2882_v45  ;;  %v1402_v8 = vpop.f32.mrb[45].mxu1 }
 0x2f9   :  { %v1403_v9 = vadd.f32 %v2882_v45, %v1402_v8 }
 0x2fa   :  { %1545 = vst.msk [vmem:[%s3083_s9 + $0x68] sm:$0xff] %vm1531_vm2, %v1408_v7 }
 0x2fb   :  { %1544 = vst.msk [vmem:[%s3083_s9 + $0x60] sm:$0xff] %vm1531_vm2, %v1403_v9  ;;  %v2113_v10 = vpop.f32.mrb[46].mxu1 }
 0x2fc   :  { %v1418_v11 = vadd.f32 %v2113_v10, %v2882_v45  ;;  %v1412_v12 = vpop.f32.mrb[47].mxu1 }
 0x2fd   :  { %v1413_v13 = vadd.f32 %v2882_v45, %v1412_v12 }
 0x2fe   :  { %1547 = vst.msk [vmem:[%s3083_s9 + $0x78] sm:$0xff] %vm1531_vm2, %v1418_v11 }
 0x2ff   :  { %1546 = vst.msk [vmem:[%s3083_s9 + $0x70] sm:$0xff] %vm1531_vm2, %v1413_v13  ;;  %v2116_v14 = vpop.f32.mrb[48].mxu1 }
 0x300   :  { %v1428_v15 = vadd.f32 %v2116_v14, %v2882_v45  ;;  %v1422_v16 = vpop.f32.mrb[49].mxu1 }
 0x301   :  { %v1423_v17 = vadd.f32 %v2882_v45, %v1422_v16 }
 0x302   :  { %1549 = vst.msk [vmem:[%s3083_s9 + $0x88] sm:$0xff] %vm1531_vm2, %v1428_v15 }
 0x303   :  { %1548 = vst.msk [vmem:[%s3083_s9 + $0x80] sm:$0xff] %vm1531_vm2, %v1423_v17  ;;  %v2119_v18 = vpop.f32.mrb[50].mxu1 }
 0x304   :  { %v1438_v19 = vadd.f32 %v2119_v18, %v2882_v45  ;;  %v1432_v20 = vpop.f32.mrb[51].mxu1 }
 0x305   :  { %v1433_v21 = vadd.f32 %v2882_v45, %v1432_v20 }
 0x306   :  { %1551 = vst.msk [vmem:[%s3083_s9 + $0x98] sm:$0xff] %vm1531_vm2, %v1438_v19 }
 0x307   :  { %1550 = vst.msk [vmem:[%s3083_s9 + $0x90] sm:$0xff] %vm1531_vm2, %v1433_v21  ;;  %v2122_v22 = vpop.f32.mrb[52].mxu1 }
 0x308   :  { %v1448_v23 = vadd.f32 %v2122_v22, %v2882_v45  ;;  %v1442_v24 = vpop.f32.mrb[53].mxu1 }
 0x309   :  { %v1443_v25 = vadd.f32 %v2882_v45, %v1442_v24 }
 0x30a   :  { %1553 = vst.msk [vmem:[%s3083_s9 + $0xa8] sm:$0xff] %vm1531_vm2, %v1448_v23 }
 0x30b   :  { %1552 = vst.msk [vmem:[%s3083_s9 + $0xa0] sm:$0xff] %vm1531_vm2, %v1443_v25  ;;  %v2125_v26 = vpop.f32.mrb[54].mxu1 }
 0x30c   :  { %v1458_v27 = vadd.f32 %v2125_v26, %v2882_v45  ;;  %v1452_v28 = vpop.f32.mrb[55].mxu1 }
 0x30d   :  { %v1453_v29 = vadd.f32 %v2882_v45, %v1452_v28 }
 0x30e   :  { %1555 = vst.msk [vmem:[%s3083_s9 + $0xb8] sm:$0xff] %vm1531_vm2, %v1458_v27 }
 0x30f   :  { %1554 = vst.msk [vmem:[%s3083_s9 + $0xb0] sm:$0xff] %vm1531_vm2, %v1453_v29  ;;  %v2128_v30 = vpop.f32.mrb[56].mxu1 }
 0x310   :  { %v1468_v31 = vadd.f32 %v2128_v30, %v2882_v45  ;;  %v1462_v32 = vpop.f32.mrb[57].mxu1 }
 0x311   :  { %v1463_v33 = vadd.f32 %v2882_v45, %v1462_v32 }
 0x312   :  { %1557 = vst.msk [vmem:[%s3083_s9 + $0xc8] sm:$0xff] %vm1531_vm2, %v1468_v31 }
 0x313   :  { %1556 = vst.msk [vmem:[%s3083_s9 + $0xc0] sm:$0xff] %vm1531_vm2, %v1463_v33  ;;  %v2131_v34 = vpop.f32.mrb[58].mxu1 }
 0x314   :  { %v1478_v35 = vadd.f32 %v2131_v34, %v2882_v45  ;;  %v1472_v36 = vpop.f32.mrb[59].mxu1 }
 0x315   :  { %v1473_v37 = vadd.f32 %v2882_v45, %v1472_v36 }
 0x316   :  { %1559 = vst.msk [vmem:[%s3083_s9 + $0xd8] sm:$0xff] %vm1531_vm2, %v1478_v35 }
 0x317   :  { %1558 = vst.msk [vmem:[%s3083_s9 + $0xd0] sm:$0xff] %vm1531_vm2, %v1473_v37  ;;  %v2134_v38 = vpop.f32.mrb[60].mxu1 }
 0x318   :  { %v1488_v39 = vadd.f32 %v2134_v38, %v2882_v45  ;;  %v1482_v40 = vpop.f32.mrb[61].mxu1 }
 0x319   :  { %v1483_v41 = vadd.f32 %v2882_v45, %v1482_v40 }
 0x31a   :  { %1561 = vst.msk [vmem:[%s3083_s9 + $0xe8] sm:$0xff] %vm1531_vm2, %v1488_v39 }
 0x31b   :  { %1560 = vst.msk [vmem:[%s3083_s9 + $0xe0] sm:$0xff] %vm1531_vm2, %v1483_v41  ;;  %v2137_v42 = vpop.f32.mrb[62].mxu1 }
 0x31c   :  { %v1498_v43 = vadd.f32 %v2137_v42, %v2882_v45  ;;  %v1492_v44 = vpop.f32.mrb[63].mxu1 }
 0x31d   :  { %v1493_v46 = vadd.f32 %v2882_v45, %v1492_v44 }
 0x31e   :  { %1563 = vst.msk [vmem:[%s3083_s9 + $0xf8] sm:$0xff] %vm1531_vm2, %v1498_v43 }
 0x31f   :  { %1562 = vst.msk [vmem:[%s3083_s9 + $0xf0] sm:$0xff] %vm1531_vm2, %v1493_v46  ;;  %v2140_v47 = vpop.f32.mrb[64].mxu1 }
 0x320   :  { %v1508_v49 = vadd.f32 %v2140_v47, %v2882_v45  ;;  %v1502_v50 = vpop.f32.mrb[65].mxu1 }
 0x321   :  { %v1503_v58 = vadd.f32 %v2882_v45, %v1502_v50 }
 0x322   :  { %1565 = vst.msk [vmem:[%s3083_s9 + $0x108] sm:$0xff] %vm1531_vm2, %v1508_v49 }
 0x323   :  { %1564 = vst.msk [vmem:[%s3083_s9 + $0x100] sm:$0xff] %vm1531_vm2, %v1503_v58  ;;  %v2143_v51 = vpop.f32.mrb[66].mxu1 }
 0x324   :  { %v1518_v52 = vadd.f32 %v2143_v51, %v2882_v45  ;;  %v1512_v53 = vpop.f32.mrb[67].mxu1 }
 0x325   :  { %v1513_v54 = vadd.f32 %v2882_v45, %v1512_v53 }
 0x326   :  { %1567 = vst.msk [vmem:[%s3083_s9 + $0x118] sm:$0xff] %vm1531_vm2, %v1518_v52 }
 0x327   :  { %1566 = vst.msk [vmem:[%s3083_s9 + $0x110] sm:$0xff] %vm1531_vm2, %v1513_v54  ;;  %v2146_v55 = vpop.f32.mrb[68].mxu1 }
 0x328   :  { %v1528_v56 = vadd.f32 %v2146_v55, %v2882_v45  ;;  %v1522_v57 = vpop.f32.mrb[69].mxu1 }
 0x329   :  { %v1523_v59 = vadd.f32 %v2882_v45, %v1522_v57 }
 0x32a   :  { %1569 = vst.msk [vmem:[%s3083_s9 + $0x128] sm:$0xff] %vm1531_vm2, %v1528_v56 }
 0x32b   :  { %1568 = vst.msk [vmem:[%s3083_s9 + $0x120] sm:$0xff] %vm1531_vm2, %v1523_v59 }

</bundles_post_ra>
